<compile_context>
chip_gen: v5e
topology: v5e:2x2
jax: 0.10.0
libtpu: 0.0.40
codegen_flags: <defaults>
</compile_context>

<pallas_src>
import functools

import jax
import jax.numpy as jnp
from jax.experimental import pallas as pl
from jax.experimental.pallas import tpu as pltpu

HIDDEN = 64
LANE = 128          # lane width; all feature dims padded to 128 for dense MXU/stores
BF16_SUBLANE = 16   # bf16 packed sublane tile height

# Conservative double-buffered tile budget; v7x scoped default is 32 MiB (64 MiB phys).
VMEM_TILE_BUDGET = 12 * 1024 * 1024


def _round_up(n, m):
    return (n + m - 1) // m * m


def qnetwork_kernel(x_ref, w_ref, b_ref, o_ref, *, state_size):
    """One batch tile of the 3-layer MLP.

    x_ref: [TB, S]        f32 (cast to bf16 in-kernel; avoids a wrapper pass over x)
    w_ref: [3*LANE, LANE] bf16, w1/w2/w3 at fixed 128-row offsets (aligned views)
    b_ref: [8, LANE]      f32, rows 0/1/2 = b1/b2/b3, zero padded
    o_ref: [TB, LANE]     bf16 (lane-dense unmasked store; real lanes [:action_size])
    """
    x = x_ref[...].astype(jnp.bfloat16)

    w1 = w_ref[0:state_size, :]       # starts at row 0 -> packed-tile aligned view
    w2 = w_ref[LANE:2 * LANE, :]      # full 128-row segments -> free views
    w3 = w_ref[2 * LANE:3 * LANE, :]
    b1 = b_ref[0:1, :]
    b2 = b_ref[1:2, :]
    b3 = b_ref[2:3, :]

    # fc1 + relu: bf16 operands on the MXU, f32 accumulate/bias/ReLU (v5e-safe).
    h1 = jnp.dot(x, w1, preferred_element_type=jnp.float32) + b1
    h1 = jnp.maximum(h1, 0.0).astype(jnp.bfloat16)

    # fc2 + relu (padded rows/lanes of the slab are zero, so full-128 matmuls are exact).
    h2 = jnp.dot(h1, w2, preferred_element_type=jnp.float32) + b2
    h2 = jnp.maximum(h2, 0.0).astype(jnp.bfloat16)

    # fc3: f32 accumulate + bias, bf16 store (halves output HBM writeback).
    out = jnp.dot(h2, w3, preferred_element_type=jnp.float32) + b3
    o_ref[...] = out.astype(jnp.bfloat16)


def init_params(key, state_size, action_size):
    """Deterministic init mimicking nn.Linear: U(-1/sqrt(fan_in), 1/sqrt(fan_in))."""
    def linear(key, fan_in, fan_out):
        kw, kb = jax.random.split(key)
        bound = 1.0 / jnp.sqrt(fan_in)
        # Stored as [in, out] (transpose of PyTorch's [out, in]) for x @ W.
        w = jax.random.uniform(kw, (fan_in, fan_out), jnp.float32, -bound, bound)
        b = jax.random.uniform(kb, (1, fan_out), jnp.float32, -bound, bound)
        return w, b

    k1, k2, k3 = jax.random.split(key, 3)
    w1, b1 = linear(k1, state_size, HIDDEN)
    w2, b2 = linear(k2, HIDDEN, HIDDEN)
    w3, b3 = linear(k3, HIDDEN, action_size)
    return (w1, b1, w2, b2, w3, b3)


def pack_params(params):
    """Pack the 6 params into one bf16 weight slab + one f32 bias slab (do once).

    Weight segments live at fixed 128-row offsets so in-kernel slices are
    bf16 packed-tile aligned views (no VMEM relayout per grid step).
    """
    w1, b1, w2, b2, w3, b3 = params
    S, H = w1.shape
    A = w3.shape[1]
    assert H == HIDDEN and w2.shape == (H, H) and w3.shape[0] == H
    assert S <= LANE and A <= LANE

    w_slab = jnp.zeros((3 * LANE, LANE), jnp.float32)
    w_slab = w_slab.at[0:S, 0:H].set(w1)
    w_slab = w_slab.at[LANE:LANE + H, 0:H].set(w2)
    w_slab = w_slab.at[2 * LANE:2 * LANE + H, 0:A].set(w3)
    w_slab = w_slab.astype(jnp.bfloat16)

    b_slab = jnp.zeros((8, LANE), jnp.float32)
    b_slab = b_slab.at[0:1, 0:H].set(b1)
    b_slab = b_slab.at[1:2, 0:H].set(b2)
    b_slab = b_slab.at[2:3, 0:A].set(b3)

    return w_slab, b_slab, (S, A)


def _pick_batch_tile(B, S, batch_tile):
    """Batch tile: >= 2 grid steps for mid-size batches (v7x dual-TC), multiple of
    the bf16 sublane tile, clamped against a conservative VMEM budget."""
    if B <= BF16_SUBLANE:
        return B  # single full-batch block (full-dim blocks are always legal)

    # Double-buffered per-row VMEM: x tile (f32) + out tile (bf16).
    bytes_per_row = 2 * (S * 4 + LANE * 2)
    tb_vmem_cap = max(BF16_SUBLANE,
                      (VMEM_TILE_BUDGET // bytes_per_row) // BF16_SUBLANE * BF16_SUBLANE)

    tb = min(batch_tile, _round_up(pl.cdiv(B, 2), BF16_SUBLANE))
    tb = min(tb, tb_vmem_cap)
    tb = max(BF16_SUBLANE, tb // BF16_SUBLANE * BF16_SUBLANE)
    return tb


def qnetwork_forward(x, packed, *, batch_tile=1024, slice_output=True):
    """Q(s) for a batch of states.

    Returns (B, action_size) f32 when slice_output=True (matches the nn.Module);
    otherwise the raw (B, 128) bf16 lane-padded slab (cheaper for fused consumers,
    e.g. an argmax over actions).
    """
    w_slab, b_slab, (S, A) = packed
    B = x.shape[0]
    assert x.shape[1] == S

    tb = _pick_batch_tile(B, S, batch_tile)
    grid = (pl.cdiv(B, tb),)

    flops = 2 * B * (S * LANE + LANE * LANE + LANE * LANE)
    bytes_accessed = (B * S * jnp.dtype(x.dtype).itemsize
                      + w_slab.size * 2 + b_slab.size * 4
                      + B * LANE * 2)

    out = pl.pallas_call(
        functools.partial(qnetwork_kernel, state_size=S),
        out_shape=jax.ShapeDtypeStruct((B, LANE), jnp.bfloat16),
        grid_spec=pltpu.PrefetchScalarGridSpec(
            num_scalar_prefetch=0,
            grid=grid,
            in_specs=[
                pl.BlockSpec((tb, S), lambda i: (i, 0)),           # x: batch-tiled, no wrapper pad/cast
                pl.BlockSpec((3 * LANE, LANE), lambda i: (0, 0)),  # weights: VMEM-resident
                pl.BlockSpec((8, LANE), lambda i: (0, 0)),         # biases: VMEM-resident
            ],
            out_specs=pl.BlockSpec((tb, LANE), lambda i: (i, 0)),  # lane-dense bf16 store
        ),
        compiler_params=pltpu.CompilerParams(
            dimension_semantics=("parallel",)),
        cost_estimate=pl.CostEstimate(
            flops=flops, transcendentals=0, bytes_accessed=bytes_accessed),
    )(x, w_slab, b_slab)

    if not slice_output:
        return out
    # Tiny (B, A) slice; cast back to f32 to match the original module's output dtype.
    return out[:, :A].astype(jnp.float32)


def reference_forward(x, params):
    """Pure-JAX reference mirroring the kernel's bf16-operand / f32-accumulate path."""
    w1, b1, w2, b2, w3, b3 = params
    bf = lambda a: a.astype(jnp.bfloat16)
    h1 = jnp.maximum(jnp.dot(bf(x), bf(w1), preferred_element_type=jnp.float32) + b1, 0.0)
    h2 = jnp.maximum(jnp.dot(bf(h1), bf(w2), preferred_element_type=jnp.float32) + b2, 0.0)
    return jnp.dot(bf(h2), bf(w3), preferred_element_type=jnp.float32) + b3


if __name__ == "__main__":
    key = jax.random.PRNGKey(0)
    k_params, k_x1, k_x2 = jax.random.split(key, 3)

    state_size = 16
    action_size = 4

    params = init_params(k_params, state_size, action_size)
    packed = pack_params(params)

    # Small batch: single grid step with a full-batch block.
    x_small = jax.random.normal(k_x1, (8, state_size), jnp.float32)
    q_small = jax.block_until_ready(qnetwork_forward(x_small, packed))
    ref_small = reference_forward(x_small, params)
    assert q_small.shape == (8, action_size)
    assert q_small.dtype == jnp.float32
    # bf16 output store -> ~3-decimal-digit rounding on Q-values (intentional).
    assert jnp.allclose(q_small, ref_small, atol=2e-2, rtol=2e-2)

    # Larger ragged batch with a small tile: multi-step pipelined grid and a
    # masked partial last block (200 = 3*64 + 8), no wrapper-side batch padding.
    x_big = jax.random.normal(k_x2, (200, state_size), jnp.float32)
    q_big = jax.block_until_ready(qnetwork_forward(x_big, packed, batch_tile=64))
    ref_big = reference_forward(x_big, params)
    assert q_big.shape == (200, action_size)
    assert jnp.allclose(q_big, ref_big, atol=2e-2, rtol=2e-2)

    print("KERNEL_OK")
</pallas_src>

<mosaic_0001>
module attributes {stable_mosaic.version = 11 : i64} {
  func.func @qnetwork_kernel(%arg0: i32, %arg1: memref<8x16xf32, #tpu.memory_space<vmem>>, %arg2: memref<384x128xbf16, #tpu.memory_space<vmem>>, %arg3: memref<8x128xf32, #tpu.memory_space<vmem>>, %arg4: memref<8x128xbf16, #tpu.memory_space<vmem>>) attributes {dimension_semantics = [#tpu.dimension_semantics<parallel>], iteration_bounds = array<i64: 1>, scalar_prefetch = 0 : i64, scratch_operands = 0 : i64, tpu.core_type = #tpu.core_type<tc>, window_params = [{transform_indices = @transform_0, window_bounds = array<i64: 8, 16>}, {pipeline_mode = #tpu.pipeline_mode<synchronous>, transform_indices = @transform_1, window_bounds = array<i64: 384, 128>}, {pipeline_mode = #tpu.pipeline_mode<synchronous>, transform_indices = @transform_2, window_bounds = array<i64: 8, 128>}, {transform_indices = @transform_3, window_bounds = array<i64: 8, 128>}]} {
    %c0 = arith.constant 0 : index
    %c0_0 = arith.constant 0 : index
    %0 = vector.load %arg1[%c0, %c0_0] : memref<8x16xf32, #tpu.memory_space<vmem>>, vector<8x16xf32>
    %1 = arith.truncf %0 : vector<8x16xf32> to vector<8x16xbf16>
    %c0_1 = arith.constant 0 : index
    %c0_2 = arith.constant 0 : index
    %2 = vector.load %arg2[%c0_1, %c0_2] : memref<384x128xbf16, #tpu.memory_space<vmem>>, vector<16x128xbf16>
    %c128 = arith.constant 128 : index
    %c0_3 = arith.constant 0 : index
    %3 = vector.load %arg2[%c128, %c0_3] : memref<384x128xbf16, #tpu.memory_space<vmem>>, vector<128x128xbf16>
    %c256 = arith.constant 256 : index
    %c0_4 = arith.constant 0 : index
    %4 = vector.load %arg2[%c256, %c0_4] : memref<384x128xbf16, #tpu.memory_space<vmem>>, vector<128x128xbf16>
    %c0_5 = arith.constant 0 : index
    %c0_6 = arith.constant 0 : index
    %5 = vector.load %arg3[%c0_5, %c0_6] : memref<8x128xf32, #tpu.memory_space<vmem>>, vector<1x128xf32>
    %c1 = arith.constant 1 : index
    %c0_7 = arith.constant 0 : index
    %6 = vector.load %arg3[%c1, %c0_7] : memref<8x128xf32, #tpu.memory_space<vmem>>, vector<1x128xf32>
    %c2 = arith.constant 2 : index
    %c0_8 = arith.constant 0 : index
    %7 = vector.load %arg3[%c2, %c0_8] : memref<8x128xf32, #tpu.memory_space<vmem>>, vector<1x128xf32>
    %cst = arith.constant dense<0.000000e+00> : vector<8x128xf32>
    %8 = tpu.matmul %1, %2, %cst {dimension_numbers = #tpu.dot_dimension_numbers<[1], [0], [0], [1], [0, 0, 1, 1], [], []>} : vector<8x16xbf16>, vector<16x128xbf16>, vector<8x128xf32> -> vector<8x128xf32>
    %9 = vector.broadcast %5 : vector<1x128xf32> to vector<8x128xf32>
    %10 = arith.addf %8, %9 : vector<8x128xf32>
    %cst_9 = arith.constant 0.000000e+00 : f32
    %11 = vector.broadcast %cst_9 : f32 to vector<8x128xf32>
    %12 = arith.maximumf %10, %11 : vector<8x128xf32>
    %13 = arith.truncf %12 : vector<8x128xf32> to vector<8x128xbf16>
    %cst_10 = arith.constant dense<0.000000e+00> : vector<8x128xf32>
    %14 = tpu.matmul %13, %3, %cst_10 {dimension_numbers = #tpu.dot_dimension_numbers<[1], [0], [0], [1], [0, 0, 1, 1], [], []>} : vector<8x128xbf16>, vector<128x128xbf16>, vector<8x128xf32> -> vector<8x128xf32>
    %15 = vector.broadcast %6 : vector<1x128xf32> to vector<8x128xf32>
    %16 = arith.addf %14, %15 : vector<8x128xf32>
    %cst_11 = arith.constant 0.000000e+00 : f32
    %17 = vector.broadcast %cst_11 : f32 to vector<8x128xf32>
    %18 = arith.maximumf %16, %17 : vector<8x128xf32>
    %19 = arith.truncf %18 : vector<8x128xf32> to vector<8x128xbf16>
    %cst_12 = arith.constant dense<0.000000e+00> : vector<8x128xf32>
    %20 = tpu.matmul %19, %4, %cst_12 {dimension_numbers = #tpu.dot_dimension_numbers<[1], [0], [0], [1], [0, 0, 1, 1], [], []>} : vector<8x128xbf16>, vector<128x128xbf16>, vector<8x128xf32> -> vector<8x128xf32>
    %21 = vector.broadcast %7 : vector<1x128xf32> to vector<8x128xf32>
    %22 = arith.addf %20, %21 : vector<8x128xf32>
    %23 = arith.truncf %22 : vector<8x128xf32> to vector<8x128xbf16>
    %c0_13 = arith.constant 0 : index
    %c0_14 = arith.constant 0 : index
    %24 = vector.load %arg4[%c0_13, %c0_14] : memref<8x128xbf16, #tpu.memory_space<vmem>>, vector<8x128xbf16>
    tpu.vector_store %arg4[%c0_13, %c0_14], %23 {strides = array<i32>} : memref<8x128xbf16, #tpu.memory_space<vmem>>, vector<8x128xbf16>,
    return
  }
  func.func @transform_0(%arg0: i32) -> (i32, i32) {
    %c0_i32 = arith.constant 0 : i32
    %c0_i32_0 = arith.constant 0 : i32
    return %arg0, %c0_i32 : i32, i32
  }
  func.func @transform_1(%arg0: i32) -> (i32, i32) {
    %c0_i32 = arith.constant 0 : i32
    %c0_i32_0 = arith.constant 0 : i32
    %c0_i32_1 = arith.constant 0 : i32
    return %c0_i32, %c0_i32_0 : i32, i32
  }
  func.func @transform_2(%arg0: i32) -> (i32, i32) {
    %c0_i32 = arith.constant 0 : i32
    %c0_i32_0 = arith.constant 0 : i32
    %c0_i32_1 = arith.constant 0 : i32
    return %c0_i32, %c0_i32_0 : i32, i32
  }
  func.func @transform_3(%arg0: i32) -> (i32, i32) {
    %c0_i32 = arith.constant 0 : i32
    %c0_i32_0 = arith.constant 0 : i32
    return %arg0, %c0_i32 : i32, i32
  }
}

</mosaic_0001>

<bundles_post_ra>
// kernel: tpu_custom_call.1
= control target key start
LH: loop header
LB: loop body
LE: loop exit
PB: predicated region body
PF: predicated region fallthrough
CT: control target
= control target key end

     0   :  { %8 = vsyncpa [#allocation3], 0  ;;  %s505_s0 = inlined_call_operand.hbm [shape: f32[8,16], index: 0, kind: input, shape index: {}]   ;;  %s506_s1 = inlined_call_operand.hbm [shape: bf16[384,128], index: 1, kind: input, shape index: {}]   ;;  %s507_s2 = inlined_call_operand.hbm [shape: f32[8,128], index: 2, kind: input, shape index: {}]   ;;  %s508_s3 = inlined_call_operand.hbm [shape: bf16[8,128], index: 3, kind: output, shape index: {}]  }
   0x1   :  { %9 = vsyncpa [#allocation6], 0  ;;  %s26_s14 = sshll.u32 %s506_s1, 4  ;;  %s27_s14 = int_to_ptr.hbm [resolvable:$true] %s26_s14 }
   0x2   :  { %10 = vsyncpa [#allocation4], 0  ;;  %s467_s15 = smov [#allocation5]   ;;  %s16_s19 = sshll.u32 %s505_s0, 4  ;;  %s17_s19 = int_to_ptr.hbm [resolvable:$true] %s16_s19 }
   0x3   :  { %s28_s16 = sshll.u32 %s467_s15, 4  ;;  %s468_s20 = smov 64   ;;  %s29_s16 = int_to_ptr.vmem [resolvable:$true] %s28_s16 }
   0x4   :  { %s469_s21 = smov 4   ;;  %s470_s22 = smov [#allocation2]  }
   0x5   :  { %34 = dma.hbm_to_vmem [thread:$0]  %s27_s14, 3072, %s29_s16, [#allocation6], %s468_s20, %s468_s20, %s469_s21  }
   0x6   :  { %s18_s23 = sshll.u32 %s470_s22, 4  ;;  %s40_s26 = sshll.u32 %s507_s2, 4  ;;  %s19_s23 = int_to_ptr.vmem [resolvable:$true] %s18_s23  ;;  %s41_s26 = int_to_ptr.hbm [resolvable:$true] %s40_s26 }
   0x7   :  { %21 = dma.hbm_to_vmem [thread:$0]  %s17_s19, 128, %s19_s23, [#allocation3]  }
   0x8   :  { %s471_s1 = smov [#allocation7]  }
   0x9   :  { %s42_s27 = sshll.u32 %s471_s1, 4  ;;  %s43_s27 = int_to_ptr.vmem [resolvable:$true] %s42_s27 }
   0xa   :  { %45 = dma.hbm_to_vmem [thread:$0]  %s41_s26, 128, %s43_s27, [#allocation6]  }
   0xb   :  { %461 = dma.done.wait [#allocation3], 128  }
   0xc   :  { %462 = vsyncadd [#allocation3], 4294967168 }
   0xd   :  { %463 = dma.done.wait [#allocation6], 3200  }
   0xe   :  { %464 = vsyncadd [#allocation6], 4294964096  ;;  %v339_v0 = vld [vmem:[#allocation5] sm:$0xff]  ;;  %v59_v1 = vld [vmem:[#allocation2] sm:$0xff]  ;;  %vm105_vm0 = vcmask 130048   ;;  %s472_s0 = smov [#allocation8]  }
   0xf   :  { %v347_v2 = vld [vmem:[#allocation5 + $0x78] sm:$0xff]  ;;  %v60_v3 = vpack.c.bf16 %v59_v1, %v59_v1  ;;  %116 = vmatpush.bf16.msra.mxu0 %v339_v0  ;;  %v346_v4 = vld [vmem:[#allocation5 + $0x70] sm:$0xff]  ;;  %v345_v5 = vld [vmem:[#allocation5 + $0x68] sm:$0xff]  ;;  %s257_s2 = sshll.u32 %s472_s0, 4  ;;  %s259_s30 = sshll.u32 %s508_s3, 4  ;;  %s258_s2 = int_to_ptr.vmem [resolvable:$true] %s257_s2  ;;  %s260_s30 = int_to_ptr.hbm [resolvable:$true] %s259_s30 }
  0x10   :  { %173 = vmatpush.bf16.msra.mxu1 %v347_v2  ;;  %v344_v6 = vld [vmem:[#allocation5 + $0x60] sm:$0xff]  ;;  %v343_v7 = vld [vmem:[#allocation5 + $0x58] sm:$0xff]  ;;  %v342_v8 = vld [vmem:[#allocation5 + $0x50] sm:$0xff] }
  0x11   :  { %v341_v9 = vld [vmem:[#allocation5 + $0x48] sm:$0xff]  ;;  %v340_v10 = vld [vmem:[#allocation5 + $0x40] sm:$0xff]  ;;  %v355_v11 = vld [vmem:[#allocation5 + $0xb8] sm:$0xff] }
  0x12   :  { %274 = vmatmul.msk.bf16.vlgmr.msra.gmra.mxu0 %vm105_vm0, %v60_v3  ;;  %237 = vmatpush.bf16.msra.mxu2 %v355_v11  ;;  %v354_v12 = vld [vmem:[#allocation5 + $0xb0] sm:$0xff]  ;;  %v353_v13 = vld [vmem:[#allocation5 + $0xa8] sm:$0xff]  ;;  %v352_v14 = vld [vmem:[#allocation5 + $0xa0] sm:$0xff] }
  0x13   :  { %v351_v15 = vld [vmem:[#allocation5 + $0x98] sm:$0xff]  ;;  %v350_v16 = vld [vmem:[#allocation5 + $0x90] sm:$0xff]  ;;  %v362_v17 = vld [vmem:[#allocation7] ss:$0 sm:$0xff] }
  0x14   :  { %174 = vmatpush.bf16.msra.mxu1 %v346_v4  ;;  %v349_v23 = vld [vmem:[#allocation5 + $0x88] sm:$0xff]  ;;  %v348_v24 = vld [vmem:[#allocation5 + $0x80] sm:$0xff] }
  0x15   :  { %v363_v25 = vld [vmem:[#allocation7 + $0x1] ss:$0 sm:$0xff]  ;;  %v364_v31 = vld [vmem:[#allocation7 + $0x2] ss:$0 sm:$0xff] }
  0x16   :  { %238 = vmatpush.bf16.msra.mxu2 %v354_v12 }
  0x18   :  { %175 = vmatpush.bf16.msra.mxu1 %v345_v5 }
  0x1a   :  { %239 = vmatpush.bf16.msra.mxu2 %v353_v13 }
  0x1c   :  { %176 = vmatpush.bf16.msra.mxu1 %v344_v6 }
  0x1e   :  { %240 = vmatpush.bf16.msra.mxu2 %v352_v14 }
  0x20   :  { %177 = vmatpush.bf16.msra.mxu1 %v343_v7 }
  0x22   :  { %241 = vmatpush.bf16.msra.mxu2 %v351_v15 }
  0x24   :  { %178 = vmatpush.bf16.msra.mxu1 %v342_v8 }
  0x26   :  { %242 = vmatpush.bf16.msra.mxu2 %v350_v16 }
  0x28   :  { %179 = vmatpush.bf16.msra.mxu1 %v341_v9 }
  0x2a   :  { %243 = vmatpush.bf16.msra.mxu2 %v349_v23 }
  0x2c   :  { %180 = vmatpush.bf16.msra.mxu1 %v340_v10 }
  0x2e   :  { %244 = vmatpush.bf16.msra.mxu2 %v348_v24 }
  0x8f   :  { %v118_v18 = vpop.f32.mrf.mxu0 }
  0x90   :  { %v119_v19 = vadd.f32 %v362_v17, %v118_v18 }
  0x92   :  { %v122_v20 = vmax.f32 %v119_v19, 0.0 }
  0x94   :  { %v123_v21 = vpack.c.bf16 %v122_v20, %v122_v20 }
  0x96   :  { %181 = vmatmul.bf16.vlgmr.msra.gmra.mxu1 %v123_v21 }
  0x97   :  { %v120_v22 = vpop.f32.mrf.mxu0 }
 0x113   :  { %v182_v26 = vpop.f32.mrf.mxu1 }
 0x114   :  { %v183_v27 = vadd.f32 %v363_v25, %v182_v26 }
 0x116   :  { %v186_v28 = vmax.f32 %v183_v27, 0.0 }
 0x118   :  { %v187_v29 = vpack.c.bf16 %v186_v28, %v186_v28 }
 0x11a   :  { %245 = vmatmul.bf16.vlgmr.msra.gmra.mxu2 %v187_v29 }
 0x11b   :  { %v184_v30 = vpop.f32.mrf.mxu1 }
 0x19d   :  { %v246_v32 = vpop.f32.mrf.mxu2 }
 0x19e   :  { %v247_v33 = vadd.f32 %v364_v31, %v246_v32 }
 0x1a0   :  { %v250_v34 = vpack.c.bf16 %v247_v33, %v247_v33 }
 0x1a2   :  { %251 = vst [vmem:[#allocation8] sm:$0xf] %v250_v34 }
 0x1a3   :  { %262 = dma.vmem_to_hbm [thread:$0]  %s258_s2, 64, %s260_s30, [#allocation4]  }
 0x1a5   :  { %v248_v35 = vpop.f32.mrf.mxu2 }
 0x1a6   :  { %465 = dma.done.wait [#allocation4], 64  }
 0x1a7   :  { %466 = vsyncadd [#allocation4], 4294967232 }
 0x1a8   :  { %267 = vsyncpa [#allocation3], 1 }
 0x1a9   :  { %268 = vsyncpa [#allocation6], 1 }
 0x1aa   :  { %269 = vsyncpa [#allocation4], 1 }

</bundles_post_ra>
